<compile_context>
chip_gen: v7x
topology: tpu7x:2x2x1
jax: 0.10.0
libtpu: 0.0.40
codegen_flags: <defaults>
</compile_context>

<pallas_src>
from math import pi as PI, log, sqrt

import numpy as np
import jax
import jax.numpy as jnp
from jax.experimental import pallas as pl
from jax.experimental.pallas import tpu as pltpu

SHIFT = float(log(2.0))  # ShiftedSoftplus shift = log(2)


def _ssp(x):
    # shifted softplus: softplus(x) - log(2), numerically stable
    return jnp.maximum(x, 0.0) + jnp.log(1.0 + jnp.exp(-jnp.abs(x))) - SHIFT


def interaction_kernel(counts_ref,
                       ea_ref, env_ref, xl_ref,
                       w1_ref, b1_ref, w2_ref, b2_ref,
                       cl2_ref, cb2_ref, bl_ref, bb_ref,
                       out_ref):
    """One grid step = one tile of target atoms.

    counts_ref [num_tiles]   SMEM, edges landing in each target tile
    ea_ref     [TN*N, G]     dense edge_attr for this target tile (bf16)
    env_ref    [TN*N, 1]     cutoff envelope * edge mask (f32, 0 off-graph)
    xl_ref     [N, F]        hoisted node projection x @ lin1.W (resident, f32)
    out_ref    [TN, Hp]      lane-padded output tile
    """
    tn = out_ref.shape[0]
    n_src = xl_ref.shape[0]
    nf = w1_ref.shape[1]
    cnt = counts_ref[pl.program_id(0)]

    @pl.when(cnt > 0)
    def _():
        # --- CFConv filter network: Linear -> ssp -> Linear (f32 accumulation) ---
        f1 = _ssp(jnp.dot(ea_ref[...], w1_ref[...],
                          preferred_element_type=jnp.float32) + b1_ref[...])
        filt = jnp.dot(f1, w2_ref[...],
                       preferred_element_type=jnp.float32) + b2_ref[...]       # [eb, F]
        # Precomputed envelope; zero on non-edges also masks the bias-induced
        # nonzero filter rows of fake edges.
        filt = filt * env_ref[...]                                             # [eb, F]

        # --- message passing: gather == broadcast over targets,
        #     scatter-add == reduce over sources (XLU). n_src % 8 == 0 is
        #     guaranteed by the wrapper so the reshape is layout-preserving. ---
        msg = filt.reshape(tn, n_src, nf) * xl_ref[...][None, :, :]            # [TN,N,F]
        agg = jnp.sum(msg, axis=1)                                             # [TN, F]

        # --- CFConv lin2 (+bias), block act, block lin (lane-padded) ---
        y = _ssp(jnp.dot(agg, cl2_ref[...],
                         preferred_element_type=jnp.float32) + cb2_ref[...])   # [TN, H]
        out_ref[...] = (jnp.dot(y, bl_ref[...],
                                preferred_element_type=jnp.float32)
                        + bb_ref[...]).astype(out_ref.dtype)

    @pl.when(cnt == 0)
    def _():
        # No incoming edges for this target tile: the aggregate is exactly zero.
        y0 = jnp.broadcast_to(_ssp(cb2_ref[...]), (tn, cb2_ref.shape[1]))      # [TN, H]
        out_ref[...] = (jnp.dot(y0, bl_ref[...],
                                preferred_element_type=jnp.float32)
                        + bb_ref[...]).astype(out_ref.dtype)


def _device_vmem_limit_bytes():
    """~75% of per-core physical VMEM (~96 MiB on v5e/v6e, ~48 MiB on v7x)."""
    try:
        cap = int(pltpu.get_tpu_info().vmem_capacity_bytes)
    except Exception:
        cap = 64 * 1024 * 1024          # conservative default (v7x-sized)
    return min((cap * 3) // 4, 100 * 1024 * 1024)


def _pick_tile_targets(n_pad, g, f, h, hp, vmem_budget_bytes):
    """Largest target-tile size whose streamed tiles + intermediates fit VMEM."""
    cands = sorted({t for t in range(8, n_pad + 1, 8) if n_pad % t == 0} | {n_pad})

    def vmem_need(tn):
        eb = tn * n_pad
        b = 2 * eb * g * 2                        # bf16 edge_attr tile, x2 buffers
        b += 2 * eb * 128 * 4                     # (eb,1) envelope tile pads to 128 lanes
        b += 2 * tn * hp * 4                      # output tile, x2 buffers
        b += 3 * eb * f * 4                       # f1 / filt / message f32 intermediates
        b += 2 * n_pad * f * 4                    # resident node projection
        b += 2 * (g * f * 2 + f * f * 4 + f * h * 4 + h * hp * 4
                  + 2 * f * 4 + h * 4 + hp * 4)   # resident weights / biases
        return b

    fitting = [t for t in cands if vmem_need(t) <= vmem_budget_bytes] or [cands[0]]
    # Prefer >= 2 grid steps so the "parallel" axis can split across v7x's two
    # TensorCores (on v5e/v6e this axis is just a serial loop, so it is free).
    multi = [t for t in fitting if n_pad // t >= 2]
    return max(multi) if multi else max(fitting)


def interaction_block_forward(x, edge_index, edge_weight, edge_attr, params, *,
                              cutoff, tile_targets=None, vmem_limit_bytes=None):
    N, H = x.shape
    G = edge_attr.shape[1]
    F_ = params["cl1"].shape[1]
    src, tgt = edge_index[0], edge_index[1]

    vmem_limit = int(vmem_limit_bytes or _device_vmem_limit_bytes())

    # Pad atom count to a multiple of 8 so the in-kernel (targets, sources)
    # split of the edge axis stays layout-preserving.
    Np = ((N + 7) // 8) * 8
    x_p = x if Np == N else jnp.pad(x, ((0, Np - N), (0, 0)))

    # Pad the output lane dim to 128 so the output store path is lane-dense.
    Hp = max(128, ((H + 127) // 128) * 128)

    # Hoisted node projection (identical on every grid step -> plain XLA, once).
    xl = x_p @ params["cl1"]                                     # f32 [Np, F]

    # Glue: densify the edge list onto a [N_target, N_source] adjacency.
    # TODO(synk): duplicate edges (multigraph) would need `.add` instead of
    # `.set`; radius_graph never produces duplicates so `.set` is exact here.
    dense_attr = jnp.zeros((Np, Np, G), jnp.float32).at[tgt, src].set(edge_attr)
    env_dense = jnp.zeros((Np, Np), jnp.float32).at[tgt, src].set(
        0.5 * (jnp.cos(edge_weight * (PI / cutoff)) + 1.0))      # envelope * mask
    mask_dense = jnp.zeros((Np, Np), jnp.float32).at[tgt, src].set(1.0)

    E = Np * Np
    ea = dense_attr.reshape(E, G).astype(jnp.bfloat16)   # bf16 halves the big stream
    env = env_dense.reshape(E, 1)
    # TODO(synk): env is still a lane-sparse (eb,1) stream in VMEM; a lane-dense
    # (TN, Np) block needs an in-kernel lane->sublane relayout (or a
    # flash-attention-style pre-broadcast) and is deferred.

    TN = tile_targets or _pick_tile_targets(Np, G, F_, H, Hp, (vmem_limit * 7) // 10)
    assert Np % TN == 0 and (TN % 8 == 0 or TN == Np), (TN, Np)
    num_tiles = Np // TN
    eb = TN * Np

    # Per-target-tile edge counts (scalar prefetch -> SMEM): empty tiles skip
    # the filter MLP / aggregation entirely.
    tile_counts = mask_dense.reshape(num_tiles, TN * Np).sum(axis=1).astype(jnp.int32)

    w1 = params["w1"].astype(jnp.bfloat16)
    b1, w2, b2 = params["b1"], params["w2"], params["b2"]
    cl2, cb2 = params["cl2"], params["cb2"]
    bl_p = jnp.pad(params["bl"], ((0, 0), (0, Hp - H)))
    bb_p = jnp.pad(params["bb"], ((0, 0), (0, Hp - H)))

    inputs = (tile_counts, ea, env, xl, w1, b1, w2, b2, cl2, cb2, bl_p, bb_p)

    cost = pl.CostEstimate(
        flops=int(2 * E * G * F_ + 2 * E * F_ * F_ + 4 * E * F_
                  + 2 * Np * F_ * H + 2 * Np * H * Hp),
        transcendentals=int(E * F_ + Np * H),
        bytes_accessed=int(sum(a.nbytes for a in inputs) + Np * Hp * 4),
    )

    grid_spec = pltpu.PrefetchScalarGridSpec(
        num_scalar_prefetch=1,
        grid=(num_tiles,),
        in_specs=[
            pl.BlockSpec((eb, G), lambda i, c: (i, 0)),    # dense edge_attr (streamed)
            pl.BlockSpec((eb, 1), lambda i, c: (i, 0)),    # envelope * mask (streamed)
            pl.BlockSpec((Np, F_), lambda i, c: (0, 0)),   # xl = x @ lin1.W (resident)
            pl.BlockSpec((G, F_), lambda i, c: (0, 0)),    # mlp[0].weight (bf16)
            pl.BlockSpec((1, F_), lambda i, c: (0, 0)),    # mlp[0].bias
            pl.BlockSpec((F_, F_), lambda i, c: (0, 0)),   # mlp[2].weight
            pl.BlockSpec((1, F_), lambda i, c: (0, 0)),    # mlp[2].bias
            pl.BlockSpec((F_, H), lambda i, c: (0, 0)),    # conv.lin2.weight
            pl.BlockSpec((1, H), lambda i, c: (0, 0)),     # conv.lin2.bias
            pl.BlockSpec((H, Hp), lambda i, c: (0, 0)),    # block lin.weight (lane-padded)
            pl.BlockSpec((1, Hp), lambda i, c: (0, 0)),    # block lin.bias (lane-padded)
        ],
        out_specs=pl.BlockSpec((TN, Hp), lambda i, c: (i, 0)),
    )
    # TODO(synk): constant-index residents (xl, weights) could use
    # pipeline_mode=pl.Buffered(1) to drop their second pipeline buffer.

    out = pl.pallas_call(
        interaction_kernel,
        out_shape=jax.ShapeDtypeStruct((Np, Hp), jnp.float32),
        grid_spec=grid_spec,
        compiler_params=pltpu.CompilerParams(
            dimension_semantics=("parallel",),
            vmem_limit_bytes=vmem_limit),
        cost_estimate=cost,
    )(*inputs)
    return out[:N, :H]


def interaction_block_reference(x, edge_index, edge_weight, edge_attr, params, *,
                                cutoff):
    """Pure-JAX (f32, edge-list) reference matching the PyTorch module."""
    N = x.shape[0]
    src, tgt = edge_index[0], edge_index[1]
    C = 0.5 * (jnp.cos(edge_weight * PI / cutoff) + 1.0)
    W = (_ssp(edge_attr @ params["w1"] + params["b1"]) @ params["w2"]
         + params["b2"]) * C[:, None]
    xl = x @ params["cl1"]
    msg = xl[src] * W
    agg = jax.ops.segment_sum(msg, tgt, num_segments=N)
    y = _ssp(agg @ params["cl2"] + params["cb2"])
    return y @ params["bl"] + params["bb"]


def init_params(key, *, hidden, num_filters, num_gaussians):
    def xavier(k, fan_in, fan_out):
        bound = sqrt(6.0 / (fan_in + fan_out))
        # stored as [in, out] (transposed vs PyTorch Linear's [out, in])
        return jax.random.uniform(k, (fan_in, fan_out), jnp.float32, -bound, bound)

    ks = jax.random.split(key, 9)
    return {
        "w1": xavier(ks[0], num_gaussians, num_filters),     # mlp[0]
        "b1": 0.1 * jax.random.normal(ks[1], (1, num_filters), jnp.float32),
        "w2": xavier(ks[2], num_filters, num_filters),       # mlp[2]
        "b2": 0.1 * jax.random.normal(ks[3], (1, num_filters), jnp.float32),
        "cl1": xavier(ks[4], hidden, num_filters),           # conv.lin1 (no bias)
        "cl2": xavier(ks[5], num_filters, hidden),            # conv.lin2
        "cb2": 0.1 * jax.random.normal(ks[6], (1, hidden), jnp.float32),
        "bl": xavier(ks[7], hidden, hidden),                  # block lin
        "bb": 0.1 * jax.random.normal(ks[8], (1, hidden), jnp.float32),
    }


if __name__ == "__main__":
    N_ATOMS = 16
    HIDDEN = 32
    NUM_FILTERS = 32
    NUM_GAUSSIANS = 16
    CUTOFF = 2.5

    key = jax.random.PRNGKey(0)
    kx, kpos, kparam = jax.random.split(key, 3)

    x = jax.random.normal(kx, (N_ATOMS, HIDDEN), jnp.float32)
    pos = jax.random.uniform(kpos, (N_ATOMS, 3), jnp.float32, 0.0, 2.0)

    # Radius graph (all pairs within cutoff, no self loops) built host-side —
    # InteractionBlock itself takes the edge list as an input.
    pos_np = np.asarray(jax.device_get(pos))
    d = np.sqrt(((pos_np[:, None, :] - pos_np[None, :, :]) ** 2).sum(-1))
    adj = (d <= CUTOFF) & (~np.eye(N_ATOMS, dtype=bool))
    src_np, tgt_np = np.nonzero(adj)
    edge_index = jnp.asarray(np.stack([src_np, tgt_np]), dtype=jnp.int32)
    edge_weight = jnp.asarray(d[src_np, tgt_np], dtype=jnp.float32)

    # Gaussian-smearing edge attributes (input to the block, as in SchNet)
    offset = jnp.linspace(0.0, CUTOFF, NUM_GAUSSIANS, dtype=jnp.float32)
    delta = CUTOFF / (NUM_GAUSSIANS - 1)
    coeff = -0.5 / (delta ** 2)
    edge_attr = jnp.exp(coeff * (edge_weight[:, None] - offset[None, :]) ** 2)

    params = init_params(kparam, hidden=HIDDEN, num_filters=NUM_FILTERS,
                         num_gaussians=NUM_GAUSSIANS)

    out = interaction_block_forward(x, edge_index, edge_weight, edge_attr, params,
                                    cutoff=CUTOFF)
    out = jax.block_until_ready(out)

    ref = jax.block_until_ready(
        interaction_block_reference(x, edge_index, edge_weight, edge_attr, params,
                                    cutoff=CUTOFF))

    assert out.shape == (N_ATOMS, HIDDEN), out.shape
    assert bool(jnp.all(jnp.isfinite(out)))
    assert bool(jnp.allclose(out, ref, rtol=2e-2, atol=2e-2)), (
        "max abs err", float(jnp.max(jnp.abs(out - ref))))
    print("KERNEL_OK")
</pallas_src>

<mosaic_0001>
module attributes {stable_mosaic.version = 11 : i64} {
  func.func @interaction_kernel(%arg0: i32, %arg1: memref<2xi32, #tpu.memory_space<smem>>, %arg2: memref<128x16xbf16, #tpu.memory_space<vmem>>, %arg3: memref<128x1xf32, #tpu.memory_space<vmem>>, %arg4: memref<16x32xf32, #tpu.memory_space<vmem>>, %arg5: memref<16x32xbf16, #tpu.memory_space<vmem>>, %arg6: memref<1x32xf32, #tpu.memory_space<vmem>>, %arg7: memref<32x32xf32, #tpu.memory_space<vmem>>, %arg8: memref<1x32xf32, #tpu.memory_space<vmem>>, %arg9: memref<32x32xf32, #tpu.memory_space<vmem>>, %arg10: memref<1x32xf32, #tpu.memory_space<vmem>>, %arg11: memref<32x128xf32, #tpu.memory_space<vmem>>, %arg12: memref<1x128xf32, #tpu.memory_space<vmem>>, %arg13: memref<8x128xf32, #tpu.memory_space<vmem>>) attributes {dimension_semantics = [#tpu.dimension_semantics<parallel>], iteration_bounds = array<i64: 2>, scalar_prefetch = 1 : i64, scratch_operands = 0 : i64, tpu.core_type = #tpu.core_type<tc>, window_params = [{transform_indices = @transform_0, window_bounds = array<i64: 128, 16>}, {transform_indices = @transform_1, window_bounds = array<i64: 128, 1>}, {pipeline_mode = #tpu.pipeline_mode<synchronous>, transform_indices = @transform_2, window_bounds = array<i64: 16, 32>}, {pipeline_mode = #tpu.pipeline_mode<synchronous>, transform_indices = @transform_3, window_bounds = array<i64: 16, 32>}, {pipeline_mode = #tpu.pipeline_mode<synchronous>, transform_indices = @transform_4, window_bounds = array<i64: 1, 32>}, {pipeline_mode = #tpu.pipeline_mode<synchronous>, transform_indices = @transform_5, window_bounds = array<i64: 32, 32>}, {pipeline_mode = #tpu.pipeline_mode<synchronous>, transform_indices = @transform_6, window_bounds = array<i64: 1, 32>}, {pipeline_mode = #tpu.pipeline_mode<synchronous>, transform_indices = @transform_7, window_bounds = array<i64: 32, 32>}, {pipeline_mode = #tpu.pipeline_mode<synchronous>, transform_indices = @transform_8, window_bounds = array<i64: 1, 32>}, {pipeline_mode = #tpu.pipeline_mode<synchronous>, transform_indices = @transform_9, window_bounds = array<i64: 32, 128>}, {pipeline_mode = #tpu.pipeline_mode<synchronous>, transform_indices = @transform_10, window_bounds = array<i64: 1, 128>}, {transform_indices = @transform_11, window_bounds = array<i64: 8, 128>}]} {
    %0 = arith.index_cast %arg0 : i32 to index
    %1 = memref.load %arg1[%0] : memref<2xi32, #tpu.memory_space<smem>>
    %c0_i32 = arith.constant 0 : i32
    %2 = arith.cmpi sgt, %1, %c0_i32 : i32
    %3 = arith.extui %2 : i1 to i32
    %c0_i32_0 = arith.constant 0 : i32
    %4 = arith.cmpi ne, %3, %c0_i32_0 : i32
    scf.if %4 {
      %c0 = arith.constant 0 : index
      %c0_3 = arith.constant 0 : index
      %8 = vector.load %arg2[%c0, %c0_3] : memref<128x16xbf16, #tpu.memory_space<vmem>>, vector<128x16xbf16>
      %c0_4 = arith.constant 0 : index
      %c0_5 = arith.constant 0 : index
      %9 = vector.load %arg5[%c0_4, %c0_5] : memref<16x32xbf16, #tpu.memory_space<vmem>>, vector<16x32xbf16>
      %cst = arith.constant dense<0.000000e+00> : vector<128x32xf32>
      %10 = tpu.matmul %8, %9, %cst {dimension_numbers = #tpu.dot_dimension_numbers<[1], [0], [0], [1], [0, 0, 1, 1], [], []>} : vector<128x16xbf16>, vector<16x32xbf16>, vector<128x32xf32> -> vector<128x32xf32>
      %c0_6 = arith.constant 0 : index
      %c0_7 = arith.constant 0 : index
      %11 = vector.load %arg6[%c0_6, %c0_7] : memref<1x32xf32, #tpu.memory_space<vmem>>, vector<1x32xf32>
      %12 = vector.broadcast %11 : vector<1x32xf32> to vector<128x32xf32>
      %13 = arith.addf %10, %12 : vector<128x32xf32>
      %cst_8 = arith.constant 0.000000e+00 : f32
      %14 = vector.broadcast %cst_8 : f32 to vector<128x32xf32>
      %15 = arith.maximumf %13, %14 : vector<128x32xf32>
      %16 = math.absf %13 : vector<128x32xf32>
      %cst_9 = arith.constant 0.000000e+00 : f32
      %17 = vector.broadcast %cst_9 : f32 to vector<128x32xf32>
      %18 = arith.subf %17, %16 : vector<128x32xf32>
      %19 = math.exp %18 : vector<128x32xf32>
      %cst_10 = arith.constant 1.000000e+00 : f32
      %20 = vector.broadcast %cst_10 : f32 to vector<128x32xf32>
      %21 = arith.addf %20, %19 : vector<128x32xf32>
      %22 = math.log %21 : vector<128x32xf32>
      %23 = arith.addf %15, %22 : vector<128x32xf32>
      %cst_11 = arith.constant 0.693147182 : f32
      %24 = vector.broadcast %cst_11 : f32 to vector<128x32xf32>
      %25 = arith.subf %23, %24 : vector<128x32xf32>
      %c0_12 = arith.constant 0 : index
      %c0_13 = arith.constant 0 : index
      %26 = vector.load %arg7[%c0_12, %c0_13] : memref<32x32xf32, #tpu.memory_space<vmem>>, vector<32x32xf32>
      %cst_14 = arith.constant dense<0.000000e+00> : vector<128x32xf32>
      %27 = tpu.matmul %25, %26, %cst_14 {dimension_numbers = #tpu.dot_dimension_numbers<[1], [0], [0], [1], [0, 0, 1, 1], [], []>} : vector<128x32xf32>, vector<32x32xf32>, vector<128x32xf32> -> vector<128x32xf32>
      %c0_15 = arith.constant 0 : index
      %c0_16 = arith.constant 0 : index
      %28 = vector.load %arg8[%c0_15, %c0_16] : memref<1x32xf32, #tpu.memory_space<vmem>>, vector<1x32xf32>
      %29 = vector.broadcast %28 : vector<1x32xf32> to vector<128x32xf32>
      %30 = arith.addf %27, %29 : vector<128x32xf32>
      %c0_17 = arith.constant 0 : index
      %c0_18 = arith.constant 0 : index
      %31 = vector.load %arg3[%c0_17, %c0_18] : memref<128x1xf32, #tpu.memory_space<vmem>>, vector<128x1xf32>
      %32 = vector.broadcast %31 : vector<128x1xf32> to vector<128x32xf32>
      %33 = arith.mulf %30, %32 : vector<128x32xf32>
      %34 = vector.shape_cast %33 : vector<128x32xf32> to vector<8x16x32xf32>
      %c0_19 = arith.constant 0 : index
      %c0_20 = arith.constant 0 : index
      %35 = vector.load %arg4[%c0_19, %c0_20] : memref<16x32xf32, #tpu.memory_space<vmem>>, vector<16x32xf32>
      %36 = vector.shape_cast %35 : vector<16x32xf32> to vector<1x16x32xf32>
      %37 = vector.broadcast %36 : vector<1x16x32xf32> to vector<8x16x32xf32>
      %38 = arith.mulf %34, %37 : vector<8x16x32xf32>
      %cst_21 = arith.constant dense<0.000000e+00> : vector<8x32xf32>
      %39 = vector.multi_reduction <add>, %38, %cst_21 [1] : vector<8x16x32xf32> to vector<8x32xf32>
      %c0_22 = arith.constant 0 : index
      %c0_23 = arith.constant 0 : index
      %40 = vector.load %arg9[%c0_22, %c0_23] : memref<32x32xf32, #tpu.memory_space<vmem>>, vector<32x32xf32>
      %cst_24 = arith.constant dense<0.000000e+00> : vector<8x32xf32>
      %41 = tpu.matmul %39, %40, %cst_24 {dimension_numbers = #tpu.dot_dimension_numbers<[1], [0], [0], [1], [0, 0, 1, 1], [], []>} : vector<8x32xf32>, vector<32x32xf32>, vector<8x32xf32> -> vector<8x32xf32>
      %c0_25 = arith.constant 0 : index
      %c0_26 = arith.constant 0 : index
      %42 = vector.load %arg10[%c0_25, %c0_26] : memref<1x32xf32, #tpu.memory_space<vmem>>, vector<1x32xf32>
      %43 = vector.broadcast %42 : vector<1x32xf32> to vector<8x32xf32>
      %44 = arith.addf %41, %43 : vector<8x32xf32>
      %cst_27 = arith.constant 0.000000e+00 : f32
      %45 = vector.broadcast %cst_27 : f32 to vector<8x32xf32>
      %46 = arith.maximumf %44, %45 : vector<8x32xf32>
      %47 = math.absf %44 : vector<8x32xf32>
      %cst_28 = arith.constant 0.000000e+00 : f32
      %48 = vector.broadcast %cst_28 : f32 to vector<8x32xf32>
      %49 = arith.subf %48, %47 : vector<8x32xf32>
      %50 = math.exp %49 : vector<8x32xf32>
      %cst_29 = arith.constant 1.000000e+00 : f32
      %51 = vector.broadcast %cst_29 : f32 to vector<8x32xf32>
      %52 = arith.addf %51, %50 : vector<8x32xf32>
      %53 = math.log %52 : vector<8x32xf32>
      %54 = arith.addf %46, %53 : vector<8x32xf32>
      %cst_30 = arith.constant 0.693147182 : f32
      %55 = vector.broadcast %cst_30 : f32 to vector<8x32xf32>
      %56 = arith.subf %54, %55 : vector<8x32xf32>
      %c0_31 = arith.constant 0 : index
      %c0_32 = arith.constant 0 : index
      %57 = vector.load %arg11[%c0_31, %c0_32] : memref<32x128xf32, #tpu.memory_space<vmem>>, vector<32x128xf32>
      %cst_33 = arith.constant dense<0.000000e+00> : vector<8x128xf32>
      %58 = tpu.matmul %56, %57, %cst_33 {dimension_numbers = #tpu.dot_dimension_numbers<[1], [0], [0], [1], [0, 0, 1, 1], [], []>} : vector<8x32xf32>, vector<32x128xf32>, vector<8x128xf32> -> vector<8x128xf32>
      %c0_34 = arith.constant 0 : index
      %c0_35 = arith.constant 0 : index
      %59 = vector.load %arg12[%c0_34, %c0_35] : memref<1x128xf32, #tpu.memory_space<vmem>>, vector<1x128xf32>
      %60 = vector.broadcast %59 : vector<1x128xf32> to vector<8x128xf32>
      %61 = arith.addf %58, %60 : vector<8x128xf32>
      %c0_36 = arith.constant 0 : index
      %c0_37 = arith.constant 0 : index
      %62 = vector.load %arg13[%c0_36, %c0_37] : memref<8x128xf32, #tpu.memory_space<vmem>>, vector<8x128xf32>
      tpu.vector_store %arg13[%c0_36, %c0_37], %61 {strides = array<i32>} : memref<8x128xf32, #tpu.memory_space<vmem>>, vector<8x128xf32>,
    } else {
    }
    %c0_i32_1 = arith.constant 0 : i32
    %5 = arith.cmpi eq, %1, %c0_i32_1 : i32
    %6 = arith.extui %5 : i1 to i32
    %c0_i32_2 = arith.constant 0 : i32
    %7 = arith.cmpi ne, %6, %c0_i32_2 : i32
    scf.if %7 {
      %c0 = arith.constant 0 : index
      %c0_3 = arith.constant 0 : index
      %8 = vector.load %arg10[%c0, %c0_3] : memref<1x32xf32, #tpu.memory_space<vmem>>, vector<1x32xf32>
      %cst = arith.constant 0.000000e+00 : f32
      %9 = vector.broadcast %cst : f32 to vector<1x32xf32>
      %10 = arith.maximumf %8, %9 : vector<1x32xf32>
      %11 = math.absf %8 : vector<1x32xf32>
      %cst_4 = arith.constant 0.000000e+00 : f32
      %12 = vector.broadcast %cst_4 : f32 to vector<1x32xf32>
      %13 = arith.subf %12, %11 : vector<1x32xf32>
      %14 = math.exp %13 : vector<1x32xf32>
      %cst_5 = arith.constant 1.000000e+00 : f32
      %15 = vector.broadcast %cst_5 : f32 to vector<1x32xf32>
      %16 = arith.addf %15, %14 : vector<1x32xf32>
      %17 = math.log %16 : vector<1x32xf32>
      %18 = arith.addf %10, %17 : vector<1x32xf32>
      %cst_6 = arith.constant 0.693147182 : f32
      %19 = vector.broadcast %cst_6 : f32 to vector<1x32xf32>
      %20 = arith.subf %18, %19 : vector<1x32xf32>
      %21 = vector.shape_cast %20 : vector<1x32xf32> to vector<1x32xf32>
      %22 = vector.broadcast %21 : vector<1x32xf32> to vector<8x32xf32>
      %c0_7 = arith.constant 0 : index
      %c0_8 = arith.constant 0 : index
      %23 = vector.load %arg11[%c0_7, %c0_8] : memref<32x128xf32, #tpu.memory_space<vmem>>, vector<32x128xf32>
      %cst_9 = arith.constant dense<0.000000e+00> : vector<8x128xf32>
      %24 = tpu.matmul %22, %23, %cst_9 {dimension_numbers = #tpu.dot_dimension_numbers<[1], [0], [0], [1], [0, 0, 1, 1], [], []>} : vector<8x32xf32>, vector<32x128xf32>, vector<8x128xf32> -> vector<8x128xf32>
      %c0_10 = arith.constant 0 : index
      %c0_11 = arith.constant 0 : index
      %25 = vector.load %arg12[%c0_10, %c0_11] : memref<1x128xf32, #tpu.memory_space<vmem>>, vector<1x128xf32>
      %26 = vector.broadcast %25 : vector<1x128xf32> to vector<8x128xf32>
      %27 = arith.addf %24, %26 : vector<8x128xf32>
      %c0_12 = arith.constant 0 : index
      %c0_13 = arith.constant 0 : index
      %28 = vector.load %arg13[%c0_12, %c0_13] : memref<8x128xf32, #tpu.memory_space<vmem>>, vector<8x128xf32>
      tpu.vector_store %arg13[%c0_12, %c0_13], %27 {strides = array<i32>} : memref<8x128xf32, #tpu.memory_space<vmem>>, vector<8x128xf32>,
    } else {
    }
    return
  }
  func.func @transform_0(%arg0: i32, %arg1: memref<2xi32, #tpu.memory_space<smem>>) -> (i32, i32) {
    %c0_i32 = arith.constant 0 : i32
    %c0_i32_0 = arith.constant 0 : i32
    return %arg0, %c0_i32 : i32, i32
  }
  func.func @transform_1(%arg0: i32, %arg1: memref<2xi32, #tpu.memory_space<smem>>) -> (i32, i32) {
    %c0_i32 = arith.constant 0 : i32
    %c0_i32_0 = arith.constant 0 : i32
    return %arg0, %c0_i32 : i32, i32
  }
  func.func @transform_2(%arg0: i32, %arg1: memref<2xi32, #tpu.memory_space<smem>>) -> (i32, i32) {
    %c0_i32 = arith.constant 0 : i32
    %c0_i32_0 = arith.constant 0 : i32
    %c0_i32_1 = arith.constant 0 : i32
    return %c0_i32, %c0_i32_0 : i32, i32
  }
  func.func @transform_3(%arg0: i32, %arg1: memref<2xi32, #tpu.memory_space<smem>>) -> (i32, i32) {
    %c0_i32 = arith.constant 0 : i32
    %c0_i32_0 = arith.constant 0 : i32
    %c0_i32_1 = arith.constant 0 : i32
    return %c0_i32, %c0_i32_0 : i32, i32
  }
  func.func @transform_4(%arg0: i32, %arg1: memref<2xi32, #tpu.memory_space<smem>>) -> (i32, i32) {
    %c0_i32 = arith.constant 0 : i32
    %c0_i32_0 = arith.constant 0 : i32
    %c0_i32_1 = arith.constant 0 : i32
    return %c0_i32, %c0_i32_0 : i32, i32
  }
  func.func @transform_5(%arg0: i32, %arg1: memref<2xi32, #tpu.memory_space<smem>>) -> (i32, i32) {
    %c0_i32 = arith.constant 0 : i32
    %c0_i32_0 = arith.constant 0 : i32
    %c0_i32_1 = arith.constant 0 : i32
    return %c0_i32, %c0_i32_0 : i32, i32
  }
  func.func @transform_6(%arg0: i32, %arg1: memref<2xi32, #tpu.memory_space<smem>>) -> (i32, i32) {
    %c0_i32 = arith.constant 0 : i32
    %c0_i32_0 = arith.constant 0 : i32
    %c0_i32_1 = arith.constant 0 : i32
    return %c0_i32, %c0_i32_0 : i32, i32
  }
  func.func @transform_7(%arg0: i32, %arg1: memref<2xi32, #tpu.memory_space<smem>>) -> (i32, i32) {
    %c0_i32 = arith.constant 0 : i32
    %c0_i32_0 = arith.constant 0 : i32
    %c0_i32_1 = arith.constant 0 : i32
    return %c0_i32, %c0_i32_0 : i32, i32
  }
  func.func @transform_8(%arg0: i32, %arg1: memref<2xi32, #tpu.memory_space<smem>>) -> (i32, i32) {
    %c0_i32 = arith.constant 0 : i32
    %c0_i32_0 = arith.constant 0 : i32
    %c0_i32_1 = arith.constant 0 : i32
    return %c0_i32, %c0_i32_0 : i32, i32
  }
  func.func @transform_9(%arg0: i32, %arg1: memref<2xi32, #tpu.memory_space<smem>>) -> (i32, i32) {
    %c0_i32 = arith.constant 0 : i32
    %c0_i32_0 = arith.constant 0 : i32
    %c0_i32_1 = arith.constant 0 : i32
    return %c0_i32, %c0_i32_0 : i32, i32
  }
  func.func @transform_10(%arg0: i32, %arg1: memref<2xi32, #tpu.memory_space<smem>>) -> (i32, i32) {
    %c0_i32 = arith.constant 0 : i32
    %c0_i32_0 = arith.constant 0 : i32
    %c0_i32_1 = arith.constant 0 : i32
    return %c0_i32, %c0_i32_0 : i32, i32
  }
  func.func @transform_11(%arg0: i32, %arg1: memref<2xi32, #tpu.memory_space<smem>>) -> (i32, i32) {
    %c0_i32 = arith.constant 0 : i32
    %c0_i32_0 = arith.constant 0 : i32
    return %arg0, %c0_i32 : i32, i32
  }
}

</mosaic_0001>

<bundles_post_ra>
// kernel: tpu_custom_call.1
= control target key start
LH: loop header
LB: loop body
LE: loop exit
PB: predicated region body
PF: predicated region fallthrough
CT: control target
= control target key end

     0   :  { %s2453_s0 = inlined_call_operand.vmem [shape: s32[2], index: 0, kind: input, shape index: {}]   ;;  %s2454_s1 = inlined_call_operand.vmem [shape: bf16[256,16], index: 1, kind: input, shape index: {}]   ;;  %s2455_s2 = inlined_call_operand.vmem [shape: f32[256,1], index: 2, kind: input, shape index: {}]   ;;  %s2456_s3 = inlined_call_operand.vmem [shape: f32[16,32], index: 3, kind: input, shape index: {}]   ;;  %s2457_s4 = inlined_call_operand.vmem [shape: bf16[16,32], index: 4, kind: input, shape index: {}]   ;;  %s2458_s5 = inlined_call_operand.vmem [shape: f32[1,32], index: 5, kind: input, shape index: {}]   ;;  %s2459_s6 = inlined_call_operand.vmem [shape: f32[32,32], index: 6, kind: input, shape index: {}]   ;;  %s2460_s7 = inlined_call_operand.vmem [shape: f32[1,32], index: 7, kind: input, shape index: {}]   ;;  %s2461_s8 = inlined_call_operand.vmem [shape: f32[32,32], index: 8, kind: input, shape index: {}]   ;;  %s2462_s9 = inlined_call_operand.vmem [shape: f32[1,32], index: 9, kind: input, shape index: {}]   ;;  %s2463_s10 = inlined_call_operand.vmem [shape: f32[32,128], index: 10, kind: input, shape index: {}]   ;;  %s2464_s11 = inlined_call_operand.vmem [shape: f32[1,128], index: 11, kind: input, shape index: {}]   ;;  %s2465_s12 = inlined_call_operand.hbm [shape: f32[16,128], index: 12, kind: output, shape index: {}]  }
   0x1   :  { %s17_s23 = sshll.u32 %s2453_s0, 4  ;;  %s18_s23 = int_to_ptr.vmem [resolvable:$true] %s17_s23 }
   0x2   :  { %s1929_s24 = scalar_lea.vmem %s18_s23, 16  ;;  %p1934_p1 = scmp.lt.s32.totalorder %s18_s23, %s18_s23 }
   0x3   :  { %p1930_p0 = scmp.ne.s32.totalorder %s18_s23, %s1929_s24  ;;  %p1935_p2 = scmp.lt.s32.totalorder %s1929_s24, %s1929_s24 }
   0x5   :  { %p1936_p3 = por %p1935_p2, %p1934_p1 }
   0x7   :  { %p1937_p4 = pnand %p1936_p3, %p1930_p0 }
   0x9   :  { %1940 = shalt.err (!%p1937_p4)  }
   0xa   :  { %s2007_s25 = smov [#allocation3]  }
   0xb   :  { %20 = dma.vmem_to_smem %s18_s23, 16, %s2007_s25, [#allocation2] }
   0xc   :  { %1985 = dma.done.wait [#allocation2], 16 }
   0xd   :  { %1986 = vsyncadd [#allocation2], 4294967280 }
   0xe   :  { %22 = sfence }
   0xf   :  { %23 = vsyncpa [#allocation5], 0 }
  0x10   :  { %25 = vsyncpa [#allocation5 + $0x1], 0  ;;  %s2084_s26 = smov 0   ;;  %s2086_s27 = smov 0  }
  0x11   :  { %s2088_s0 = smov 0   ;;  %s2090_s28 = smov 0  }
  0x12 LB: > { %2471 = sst [smem:[#allocation8_spill]] %s2001_s0  ;;  %s2105_s29 = sadd.s32 4294967295, %s2005_s28   ;;  %s2005_s28 = sphi %s2090_s28, %s2479_s28   ;;  %s2001_s0 = sphi %s2088_s0, %s2481_s0   ;;  %s1997_s27 = sphi %s2086_s27, %s2483_s27   ;;  %s1993_s26 = sphi %s2084_s26, %s2482_s26  }
  0x13   : > { %s1572_s30 = sadd.s32 4294967294, %s2005_s28   ;;  %s2109_s13 = sadd.s32 1, %s2005_s28  }
  0x14   : > { %2472 = sst [smem:[#allocation9_spill]] %s2109_s13  ;;  %s279_s14 = sadd.s32 1, %s2001_s0 }
  0x15   : > { %s276_s15 = ssub.s32 %s2005_s28, %s2109_s13  ;;  %p289_p5 = scmp.ne.s32.totalorder %s2001_s0, %s1997_s27 }
  0x16   : > { %p277_p6 = scmp.eq.s32.totalorder %s276_s15, 0  ;;  %p290_p7 = scmp.eq.s32.totalorder %s2105_s29, 1 }
  0x17   : > { %p295_p8 = scmp.ne.s32.totalorder %s1997_s27, %s1993_s26  ;;  %p296_p9 = scmp.eq.s32.totalorder %s1572_s30, 1 }
  0x18   : > { %s2120_s16 = scalar_select %p277_p6, %s2001_s0, %s279_s14  }
  0x19   : > { %p2122_p10 = por %p290_p7, %p289_p5  ;;  %p2126_p11 = por %p296_p9, %p295_p8 }
  0x1a   : > { %2473 = sst [smem:[#allocation10_spill]] %s2120_s16  ;;  %p1575_p12 = scmp.ge.s32.totalorder %s2005_s28, 1 }
  0x1b   : > { %s2475_s18 = scalar_select %p2126_p11, 1, 0 }
  0x1c   : > { %p359_p13 = scmp.lt.s32.totalorder %s2005_s28, 3 }
  0x1d   : > { %2476 = sst [smem:[#allocation11_spill]] %s2475_s18 }
  0x1e   : > { %p360_p0 = pnand %p1575_p12, %p359_p13 }
  0x1f   : > { %s2469_s19 = sand.u32 (!%p360_p0), 1, %s1997_s27   ;;  %s1577_s20 = sshll.u32 (!%p360_p0), %s2105_s29, 4 }
  0x20   : > { %363 = sbr.rel (%p360_p0) target bundleno = 1313 (0x521), region = 64  ;;  %s1576_s21 = sshll.u32 (!%p360_p0), %s2469_s19, 3 }
  0x21   : > { %p405_p1 = scmp.lt.s32.totalorder (!%p360_p0), %s1577_s20, 31  ;;  %s2137_s22 = sld [smem:[#allocation3 + %s2105_s29]] (!%p360_p0) }
  0x22   : > { %s2147_s13 = scalar_lea.vmem (!%p360_p0), [#allocation4], %s1576_s21 }
  0x27   : > { %s2485_s20 = smov (!%p405_p1, %s1577_s20), 31  ;;  %p1581_p2 = scmp.le.s32.totalorder %s2137_s22, 0 }
  0x28   : > { %s1578_s23 = sshll.u32 %s2485_s20, 2  ;;  %s1580_s24 = sshll.u32 %s2485_s20, 3  ;;  %v1848_v0 = vld [vmem:[%s2457_s4] sm:$0xff] (!%p1581_p2)   ;;  %vm493_vm0 = vcmask (!%p1581_p2), 130048   ;;  %v776_v10 = vld [vmem:[%s2459_s6 + $0x8] sm:$0xff] (!%p1581_p2)  ;;  %v777_v12 = vld [vmem:[%s2459_s6 + $0x10] sm:$0xff] (!%p1581_p2) }
  0x29   : > { %s408_s14 = scalar_lea.vmem %s2454_s1, %s1578_s23  ;;  %s2145_s0 = scalar_lea.vmem %s2455_s2, %s1580_s24  ;;  %1690 = vmatprep.subr.bf16.mxu0 (!%p1581_p2), %v1848_v0  ;;  %v775_v9 = vld [vmem:[%s2459_s6] sm:$0xff] (!%p1581_p2)  ;;  %v778_v13 = vld [vmem:[%s2459_s6 + $0x18] sm:$0xff] (!%p1581_p2)  ;;  %v2008_v17 = vmov (!%p1581_p2), 0   ;;  %vm786_vm1 = vcmask (!%p1581_p2), 261120   ;;  %vm2010_vm2 = vmmov (!%p1581_p2), 0   ;;  %vm1201_vm3 = vcmask (!%p1581_p2), 1041409  }
  0x2a   : > { %421 = sbr.rel (%p1581_p2) target bundleno = 1032 (0x408), region = 68  ;;  %v1849_v1 = vld [vmem:[%s408_s14] sm:$0xff] (!%p1581_p2)   ;;  %v1850_v2 = vld [vmem:[%s408_s14 + $0x8] sm:$0xff] (!%p1581_p2)   ;;  %1691 = vmatpush3.bf16.msra.mxu0 (!%p1581_p2), %v1848_v0  ;;  %v1851_v3 = vld [vmem:[%s408_s14 + $0x10] sm:$0xff] (!%p1581_p2)   ;;  %v1773_v11 = vpack.c.bf16 (!%p1581_p2), %v776_v10, %v775_v9  ;;  %v1777_v14 = vpack.c.bf16 (!%p1581_p2), %v778_v13, %v777_v12  ;;  %1847 = vset.pattern.permute.xlu1 (!%p1581_p2), %v2008_v17  ;;  %vm1203_vm4 = vcmask (!%p1581_p2), 1042434   ;;  %vm1205_vm5 = vcmask (!%p1581_p2), 1043459  }
  0x2b   : > { %1692 = vmatprep.mubr.msk.bf16.mxu0 (!%p1581_p2), %vm493_vm0, %v1849_v1  ;;  %v1852_v4 = vld [vmem:[%s408_s14 + $0x18] sm:$0xff] (!%p1581_p2)   ;;  %v1853_v5 = vld [vmem:[%s408_s14 + $0x20] sm:$0xff] (!%p1581_p2)   ;;  %v1854_v6 = vld [vmem:[%s408_s14 + $0x28] sm:$0xff] (!%p1581_p2)   ;;  %1846 = vset.pattern.permute.xlu0 (!%p1581_p2), %v2008_v17  ;;  %vm1207_vm6 = vcmask (!%p1581_p2), 1044484   ;;  %vm1209_vm7 = vcmask (!%p1581_p2), 1045509   ;;  %vm1211_vm8 = vcmask (!%p1581_p2), 1046534  }
  0x2c   : > { %v1855_v7 = vld [vmem:[%s408_s14 + $0x30] sm:$0xff] (!%p1581_p2)   ;;  %v1856_v8 = vld [vmem:[%s408_s14 + $0x38] sm:$0xff] (!%p1581_p2)   ;;  %1774 = vmatprep.subr.bf16.mxu1 (!%p1581_p2), %v1773_v11  ;;  %v980_v16 = vld [vmem:[%s2145_s0] sm:$0xff] (!%p1581_p2)  ;;  %vm1213_vm9 = vcmask (!%p1581_p2), 1047559  }
  0x2d   : > { %1693 = vmatmul.mubr.msk.bf16.vlgmr.msra.gmra.mrb[0].mxu0 (!%p1581_p2), %vm493_vm0, %v1850_v2  ;;  %1776 = vmatpush3.bf16.msra.mxu1 (!%p1581_p2), %v1773_v11  ;;  %v982_v15 = vld [vmem:[%s2145_s0 + $0x10] sm:$0xff] (!%p1581_p2)  ;;  %v983_v18 = vld [vmem:[%s2145_s0 + $0x18] sm:$0xff] (!%p1581_p2)  ;;  %v981_v19 = vld [vmem:[%s2145_s0 + $0x8] sm:$0xff] (!%p1581_p2) }
  0x2e   : > { %1696 = vmatprep.mubr.msk.bf16.mxu0 (!%p1581_p2), %vm493_vm0, %v1851_v3  ;;  %1778 = vmatprep.subr.bf16.mxu1 (!%p1581_p2), %v1777_v14  ;;  %v985_v20 = vld [vmem:[%s2145_s0 + $0x28] sm:$0xff] (!%p1581_p2)  ;;  %v984_v21 = vld [vmem:[%s2145_s0 + $0x20] sm:$0xff] (!%p1581_p2)  ;;  %v987_v22 = vld [vmem:[%s2145_s0 + $0x38] sm:$0xff] (!%p1581_p2) }
  0x2f   : > { %1008 = vperm.xlu1 (!%p1581_p2), %1847, %v982_v15   ;;  %998 = vperm.xlu0 (!%p1581_p2), %1846, %v980_v16   ;;  %v986_v23 = vld [vmem:[%s2145_s0 + $0x30] sm:$0xff] (!%p1581_p2)  ;;  %v989_v24 = vld [vmem:[%s2145_s0 + $0x48] sm:$0xff] (!%p1581_p2)  ;;  %v988_v25 = vld [vmem:[%s2145_s0 + $0x40] sm:$0xff] (!%p1581_p2) }
  0x30   : > { %v991_v26 = vld [vmem:[%s2145_s0 + $0x58] sm:$0xff] (!%p1581_p2)  ;;  %v990_v27 = vld [vmem:[%s2145_s0 + $0x50] sm:$0xff] (!%p1581_p2)  ;;  %v993_v28 = vld [vmem:[%s2145_s0 + $0x68] sm:$0xff] (!%p1581_p2) }
  0x31   : > { %1780 = vmatpush3.bf16.msra.mxu1 %v1777_v14  ;;  %v992_v29 = vld [vmem:[%s2145_s0 + $0x60] sm:$0xff]  ;;  %v995_v30 = vld [vmem:[%s2145_s0 + $0x78] sm:$0xff]  ;;  %v994_v31 = vld [vmem:[%s2145_s0 + $0x70] sm:$0xff] }
  0x32   : > { %v2192_v32 = vld [vmem:[%s2458_s5] ss:$0 sm:$0xff] }
  0x33   : > { %1013 = vperm.xlu1 %1847, %v983_v18   ;;  %1003 = vperm.xlu0 %1846, %v981_v19  }
  0x35   : > { %1697 = vmatmul.mubr.msk.bf16.gmra.mrb[4].mxu0 %vm493_vm0, %v1852_v4 }
  0x36   : > { %1700 = vmatprep.mubr.msk.bf16.mxu0 %vm493_vm0, %v1853_v5 }
  0x37   : > { %1023 = vperm.xlu1 %1847, %v985_v20   ;;  %1018 = vperm.xlu0 %1846, %v984_v21  }
  0x3b   : > { %1033 = vperm.xlu1 %1847, %v987_v22   ;;  %1028 = vperm.xlu0 %1846, %v986_v23  }
  0x3d   : > { %1701 = vmatmul.mubr.msk.bf16.gmra.mrb[8].mxu0 %vm493_vm0, %v1854_v6 }
  0x3e   : > { %1704 = vmatprep.mubr.msk.bf16.mxu0 %vm493_vm0, %v1855_v7 }
  0x3f   : > { %1043 = vperm.xlu1 %1847, %v989_v24   ;;  %1038 = vperm.xlu0 %1846, %v988_v25  }
  0x43   : > { %1053 = vperm.xlu1 %1847, %v991_v26   ;;  %1048 = vperm.xlu0 %1846, %v990_v27  }
  0x45   : > { %1705 = vmatmul.mubr.msk.bf16.gmra.mrb[12].mxu0 %vm493_vm0, %v1856_v8 }
  0x47   : > { %1063 = vperm.xlu1 %1847, %v993_v28   ;;  %1058 = vperm.xlu0 %1846, %v992_v29  }
  0x4b   : > { %1073 = vperm.xlu1 %1847, %v995_v30   ;;  %1068 = vperm.xlu0 %1846, %v994_v31  }
 0x100   : > { %v1694_v33 = vpop.f32.mrb[0].mxu0 }
 0x101   : > { %v2195_v34 = vadd.f32 %v1694_v33, %v2192_v32  ;;  %v552_v35 = vpop.f32.mrb[1].mxu0 }
 0x102   : > { %v2198_v36 = vadd.f32 %v2192_v32, %v552_v35  ;;  %v1695_v37 = vpop.f32.mrb[2].mxu0 }
 0x103   : > { %v633_v38 = vand.u32 2147483647, %v2195_v34  ;;  %v2202_v39 = vadd.f32 %v1695_v37, %v2192_v32  ;;  %v555_v40 = vpop.f32.mrb[3].mxu0 }
 0x104   : > { %v631_v41 = vand.u32 2147483647, %v2198_v36  ;;  %v2206_v42 = vadd.f32 %v2192_v32, %v555_v40 }
 0x105   : > { %v649_v43 = vsub.f32 0.0, %v633_v38  ;;  %v634_v44 = vand.u32 2147483647, %v2202_v39 }
 0x106   : > { %v647_v45 = vsub.f32 0.0, %v631_v41  ;;  %v632_v46 = vand.u32 2147483647, %v2206_v42 }
 0x107   : > { %v667_v47 = vmul.f32 1.442695, %v649_v43  ;;  %v650_v48 = vsub.f32 0.0, %v634_v44 }
 0x108   : > { %v663_v49 = vmul.f32 1.442695, %v647_v45  ;;  %v648_v50 = vsub.f32 0.0, %v632_v46  ;;  %v1698_v51 = vpop.f32.mrb[4].mxu0 }
 0x109   : > { %1857 = vpow2.f32 %v667_v47  ;;  %v669_v52 = vmul.f32 1.442695, %v650_v48  ;;  %v2211_v53 = vadd.f32 %v1698_v51, %v2192_v32  ;;  %v568_v54 = vpop.f32.mrb[5].mxu0 }
 0x10a   : > { %1859 = vpow2.f32 %v663_v49  ;;  %v665_v55 = vmul.f32 1.442695, %v648_v50  ;;  %v2214_v56 = vadd.f32 %v2192_v32, %v568_v54  ;;  %v1699_v57 = vpop.f32.mrb[6].mxu0 }
 0x10b   : > { %1861 = vpow2.f32 %v669_v52  ;;  %v637_v58 = vand.u32 2147483647, %v2211_v53  ;;  %v2218_v59 = vadd.f32 %v1699_v57, %v2192_v32  ;;  %v571_v60 = vpop.f32.mrb[7].mxu0 }
 0x10c   : > { %1863 = vpow2.f32 %v665_v55  ;;  %v635_v61 = vand.u32 2147483647, %v2214_v56  ;;  %v2222_v62 = vadd.f32 %v2192_v32, %v571_v60 }
 0x10d   : > { %v653_v63 = vsub.f32 0.0, %v637_v58  ;;  %v638_v0 = vand.u32 2147483647, %v2218_v59 }
 0x10e   : > { %v651_v1 = vsub.f32 0.0, %v635_v61  ;;  %v636_v2 = vand.u32 2147483647, %v2222_v62 }
 0x10f   : > { %v675_v3 = vmul.f32 1.442695, %v653_v63  ;;  %v654_v4 = vsub.f32 0.0, %v638_v0 }
 0x110   : > { %v671_v5 = vmul.f32 1.442695, %v651_v1  ;;  %v652_v6 = vsub.f32 0.0, %v636_v2  ;;  %v1702_v7 = vpop.f32.mrb[8].mxu0 }
 0x111   : > { %1865 = vpow2.f32 %v675_v3  ;;  %v677_v8 = vmul.f32 1.442695, %v654_v4  ;;  %v2227_v9 = vadd.f32 %v1702_v7, %v2192_v32  ;;  %v584_v10 = vpop.f32.mrb[9].mxu0 }
 0x112   : > { %1867 = vpow2.f32 %v671_v5  ;;  %v673_v11 = vmul.f32 1.442695, %v652_v6  ;;  %v2230_v12 = vadd.f32 %v2192_v32, %v584_v10  ;;  %v1703_v13 = vpop.f32.mrb[10].mxu0  ;;  %v615_v10 = vmax.f32 %v2198_v36, 0.0 }
 0x113   : > { %v1858_v14 = vpop.eup %1857  ;;  %1869 = vpow2.f32 %v677_v8  ;;  %v641_v15 = vand.u32 2147483647, %v2227_v9  ;;  %v2234_v16 = vadd.f32 %v1703_v13, %v2192_v32  ;;  %v587_v17 = vpop.f32.mrb[11].mxu0 }
 0x114   : > { %v1860_v18 = vpop.eup %1859  ;;  %v697_v19 = vadd.f32 1.0, %v1858_v14  ;;  %1871 = vpow2.f32 %v673_v11  ;;  %v639_v20 = vand.u32 2147483647, %v2230_v12  ;;  %v2239_v28 = vadd.f32 %v2192_v32, %v587_v17 }
 0x115   : > { %v1862_v21 = vpop.eup %1861  ;;  %v695_v22 = vadd.f32 1.0, %v1860_v18  ;;  %v657_v23 = vsub.f32 0.0, %v641_v15  ;;  %v642_v24 = vand.u32 2147483647, %v2234_v16  ;;  %v617_v18 = vmax.f32 %v2195_v34, 0.0 }
 0x116   : > { %v1864_v25 = vpop.eup %1863  ;;  %1873 = vlog2.f32 %v697_v19  ;;  %v698_v26 = vadd.f32 1.0, %v1862_v21  ;;  %v655_v27 = vsub.f32 0.0, %v639_v20  ;;  %v640_v35 = vand.u32 2147483647, %v2239_v28 }
 0x117   : > { %v696_v29 = vadd.f32 1.0, %v1864_v25  ;;  %v683_v30 = vmul.f32 1.442695, %v657_v23  ;;  %v658_v31 = vsub.f32 0.0, %v642_v24  ;;  %1875 = vlog2.f32 %v695_v22 }
 0x118   : > { %1877 = vlog2.f32 %v698_v26  ;;  %v679_v33 = vmul.f32 1.442695, %v655_v27  ;;  %v1706_v37 = vpop.f32.mrb[12].mxu0  ;;  %v656_v43 = vsub.f32 0.0, %v640_v35  ;;  %v616_v20 = vmax.f32 %v2206_v42, 0.0 }
 0x119   : > { %1879 = vlog2.f32 %v696_v29  ;;  %v685_v38 = vmul.f32 1.442695, %v658_v31  ;;  %v2243_v40 = vadd.f32 %v1706_v37, %v2192_v32  ;;  %v600_v41 = vpop.f32.mrb[13].mxu0  ;;  %v618_v26 = vmax.f32 %v2202_v39, 0.0 }
 0x11a   : > { %1881 = vpow2.f32 %v683_v30  ;;  %v2246_v44 = vadd.f32 %v2192_v32, %v600_v41  ;;  %v1707_v45 = vpop.f32.mrb[14].mxu0  ;;  %v681_v55 = vmul.f32 1.442695, %v656_v43  ;;  %v619_v39 = vmax.f32 %v2214_v56, 0.0 }
 0x11b   : > { %v1866_v46 = vpop.eup %1865  ;;  %1883 = vpow2.f32 %v679_v33  ;;  %v645_v47 = vand.u32 2147483647, %v2243_v40  ;;  %v2250_v48 = vadd.f32 %v1707_v45, %v2192_v32  ;;  %v603_v49 = vpop.f32.mrb[15].mxu0 }
 0x11c   : > { %v1868_v50 = vpop.eup %1867  ;;  %v701_v51 = vadd.f32 1.0, %v1866_v46  ;;  %1885 = vpow2.f32 %v685_v38  ;;  %v643_v58 = vand.u32 2147483647, %v2246_v44  ;;  %v2255_v0 = vadd.f32 %v2192_v32, %v603_v49 }
 0x11d   : > { %v1870_v52 = vpop.eup %1869  ;;  %v699_v54 = vadd.f32 1.0, %v1868_v50  ;;  %v661_v57 = vsub.f32 0.0, %v645_v47  ;;  %v646_v63 = vand.u32 2147483647, %v2250_v48  ;;  %v621_v49 = vmax.f32 %v2211_v53, 0.0 }
 0x11e   : > { %v1872_v60 = vpop.eup %1871  ;;  %1887 = vlog2.f32 %v701_v51  ;;  %v702_v61 = vadd.f32 1.0, %v1870_v52  ;;  %v659_v3 = vsub.f32 0.0, %v643_v58  ;;  %v644_v6 = vand.u32 2147483647, %v2255_v0 }
 0x11f   : > { %1889 = vlog2.f32 %v699_v54  ;;  %v700_v1 = vadd.f32 1.0, %v1872_v60  ;;  %v691_v2 = vmul.f32 1.442695, %v661_v57  ;;  %v662_v5 = vsub.f32 0.0, %v646_v63 }
 0x120   : > { %v1874_v4 = vpop.eup %1873  ;;  %1891 = vlog2.f32 %v702_v61  ;;  %v687_v11 = vmul.f32 1.442695, %v659_v3  ;;  %v660_v14 = vsub.f32 0.0, %v644_v6  ;;  %v620_v50 = vmax.f32 %v2222_v62, 0.0 }
 0x121   : > { %v1876_v7 = vpop.eup %1875  ;;  %v716_v8 = vmul.f32 0.6931472, %v1874_v4  ;;  %1893 = vlog2.f32 %v700_v1  ;;  %v693_v32 = vmul.f32 1.442695, %v662_v5  ;;  %v622_v1 = vmax.f32 %v2218_v59, 0.0 }
 0x122   : > { %v1878_v13 = vpop.eup %1877  ;;  %1895 = vpow2.f32 %v681_v55  ;;  %v712_v15 = vmul.f32 0.6931472, %v1876_v7  ;;  %v689_v23 = vmul.f32 1.442695, %v660_v14  ;;  %v623_v59 = vmax.f32 %v2230_v12, 0.0 }
 0x123   : > { %v1880_v17 = vpop.eup %1879  ;;  %v718_v19 = vmul.f32 0.6931472, %v1878_v13  ;;  %1897 = vpow2.f32 %v691_v2  ;;  %v745_v25 = vadd.f32 %v716_v8, %v617_v18  ;;  %v624_v12 = vmax.f32 %v2239_v28, 0.0 }
 0x124   : > { %v1882_v21 = vpop.eup %1881  ;;  %v714_v22 = vmul.f32 0.6931472, %v1880_v17  ;;  %1899 = vpow2.f32 %v687_v11  ;;  %v743_v24 = vadd.f32 %v712_v15, %v615_v10 }
 0x125   : > { %v1884_v36 = vpop.eup %1883  ;;  %v705_v27 = vadd.f32 1.0, %v1882_v21  ;;  %1901 = vpow2.f32 %v693_v32  ;;  %v746_v35 = vadd.f32 %v718_v19, %v618_v26  ;;  %v1602_v38 = vadd.f32 -0.6931472, %v745_v25 }
 0x126   : > { %v1886_v29 = vpop.eup %1885  ;;  %v744_v30 = vadd.f32 %v714_v22, %v616_v20  ;;  %v703_v31 = vadd.f32 1.0, %v1884_v36  ;;  %1903 = vpow2.f32 %v689_v23  ;;  %v1600_v34 = vadd.f32 -0.6931472, %v743_v24 }
 0x127   : > { %v706_v43 = vadd.f32 1.0, %v1886_v29  ;;  %v1603_v52 = vadd.f32 -0.6931472, %v746_v35  ;;  %v625_v21 = vmax.f32 %v2227_v9, 0.0  ;;  %v626_v26 = vmax.f32 %v2234_v16, 0.0 }
 0x128   : > { %v1888_v33 = vpop.eup %1887  ;;  %v1601_v42 = vadd.f32 -0.6931472, %v744_v30  ;;  %1905 = vlog2.f32 %v703_v31  ;;  %1716 = vmatprep.mubr.msk.f32.mxu1 %vm786_vm1, %v1600_v34  ;;  %v627_v29 = vmax.f32 %v2246_v44, 0.0  ;;  %v628_v34 = vmax.f32 %v2255_v0, 0.0 }
 0x129   : > { %v1890_v37 = vpop.eup %1889  ;;  %v724_v41 = vmul.f32 0.6931472, %v1888_v33  ;;  %1907 = vlog2.f32 %v705_v27  ;;  %v630_v0 = vmax.f32 %v2250_v48, 0.0  ;;  %v1183_v48 = vld [vmem:[%s2461_s8 + $0x8] sm:$0xff] }
 0x12a   : > { %v1892_v45 = vpop.eup %1891  ;;  %v720_v46 = vmul.f32 0.6931472, %v1890_v37  ;;  %1717 = vmatmul.mubr.msk.f32.vlgmr.msra.gmra.mrb[0].mxu1 %vm786_vm1, %v1601_v42  ;;  %1909 = vlog2.f32 %v706_v43  ;;  %v629_v43 = vmax.f32 %v2243_v40, 0.0 }
 0x12b   : > { %v1894_v47 = vpop.eup %1893  ;;  %1719 = vmatprep.mubr.msk.f32.mxu1 %vm786_vm1, %v1602_v38  ;;  %v726_v55 = vmul.f32 0.6931472, %v1892_v45  ;;  %v749_v60 = vadd.f32 %v724_v41, %v621_v49 }
 0x12c   : > { %v1896_v51 = vpop.eup %1895  ;;  %v747_v54 = vadd.f32 %v720_v46, %v619_v39  ;;  %v722_v57 = vmul.f32 0.6931472, %v1894_v47 }
 0x12d   : > { %v1898_v58 = vpop.eup %1897  ;;  %v704_v56 = vadd.f32 1.0, %v1896_v51  ;;  %v750_v5 = vadd.f32 %v726_v55, %v622_v1  ;;  %v1606_v7 = vadd.f32 -0.6931472, %v749_v60  ;;  %v2009_v51 = vmov 0.0|0.0   ;;  %v1185_v55 = vld [vmem:[%s2461_s8 + $0x18] sm:$0xff]  ;;  %v1009_v60 = vpop.permute.xlu1 %1008 }
 0x12e   : > { %v1900_v61 = vpop.eup %1899  ;;  %v1604_v63 = vadd.f32 -0.6931472, %v747_v54  ;;  %v748_v2 = vadd.f32 %v722_v57, %v620_v50  ;;  %v709_v3 = vadd.f32 1.0, %v1898_v58  ;;  %1720 = vmatmul.mubr.msk.f32.gmra.mrb[2].mxu1 %vm786_vm1, %v1603_v52  ;;  %v1182_v50 = vld [vmem:[%s2461_s8] sm:$0xff]  ;;  %1781 = vmatprep.subr.bf16.mxu0 %v2009_v51  ;;  %v1184_v54 = vld [vmem:[%s2461_s8 + $0x10] sm:$0xff]  ;;  %v2011_v58 = vmov 0.0  }
 0x12f   : > { %v1902_v53 = vpop.eup %1901  ;;  %1911 = vlog2.f32 %v704_v56  ;;  %v707_v62 = vadd.f32 1.0, %v1900_v61  ;;  %v1607_v14 = vadd.f32 -0.6931472, %v750_v5  ;;  %v1782_v52 = vpack.c.bf16 %v1183_v48, %v1182_v50  ;;  %1787 = vmatprep.subr.bf16.mxu1 %v2009_v51  ;;  %1748 = vmatprep.mubr.msk.f32.mxu0 %vm2010_vm2, %v2011_v58  ;;  %v999_v56 = vpop.permute.xlu0 %998  ;;  %v2308_v61 = vld [vmem:[%s2460_s7] ss:$0 sm:$0xff] }
 0x130   : > { %v1904_v4 = vpop.eup %1903  ;;  %v1605_v6 = vadd.f32 -0.6931472, %v748_v2  ;;  %1722 = vmatprep.mubr.msk.f32.mxu1 %vm786_vm1, %v1604_v63  ;;  %v710_v8 = vadd.f32 1.0, %v1902_v53  ;;  %v1785_v57 = vpack.c.bf16 %v1185_v55, %v1184_v54 }
 0x131   : > { %1913 = vlog2.f32 %v707_v62  ;;  %v708_v10 = vadd.f32 1.0, %v1904_v4  ;;  %1783 = vmatpush3.bf16.msra.mxu0 %v1782_v52  ;;  %v1014_v63 = vpop.permute.xlu1 %1013  ;;  %v2314_v62 = vld [vmem:[%s2456_s3 + $0x8] sm:$0xff] }
 0x132   : > { %v1906_v11 = vpop.eup %1905  ;;  %1915 = vlog2.f32 %v709_v3  ;;  %1723 = vmatmul.mubr.msk.f32.gmra.mrb[4].mxu1 %vm786_vm1, %v1605_v6  ;;  %1784 = vmatprep.subr.bf16.mxu0 %v2009_v51  ;;  %v2320_v6 = vld [vmem:[%s2456_s3] sm:$0xff] }
 0x133   : > { %v728_v13 = vmul.f32 0.6931472, %v1906_v11  ;;  %1917 = vlog2.f32 %v708_v10  ;;  %1725 = vmatprep.mubr.msk.f32.mxu1 %vm786_vm1, %v1606_v7  ;;  %v1908_v32 = vpop.eup %1907  ;;  %v1004_v2 = vpop.permute.xlu0 %1003 }
 0x134   : > { %1919 = vlog2.f32 %v710_v8  ;;  %v1910_v17 = vpop.eup %1909  ;;  %v732_v18 = vmul.f32 0.6931472, %v1908_v32 }
 0x135   : > { %v751_v15 = vadd.f32 %v728_v13, %v623_v59  ;;  %v734_v22 = vmul.f32 0.6931472, %v1910_v17  ;;  %1786 = vmatpush3.bf16.msra.mxu0 %v1785_v57  ;;  %v1024_v13 = vpop.permute.xlu1 %1023 }
 0x136   : > { %1726 = vmatmul.mubr.msk.f32.gmra.mrb[6].mxu1 %vm786_vm1, %v1607_v14  ;;  %v753_v36 = vadd.f32 %v732_v18, %v625_v21 }
 0x137   : > { %v1608_v19 = vadd.f32 -0.6931472, %v751_v15  ;;  %v754_v33 = vadd.f32 %v734_v22, %v626_v26  ;;  %v1019_v15 = vpop.permute.xlu0 %1018 }
 0x138   : > { %v1610_v38 = vadd.f32 -0.6931472, %v753_v36 }
 0x139   : > { %v1912_v20 = vpop.eup %1911  ;;  %1728 = vmatprep.mubr.msk.f32.mxu1 %vm786_vm1, %v1608_v19  ;;  %v1611_v44 = vadd.f32 -0.6931472, %v754_v33 }
 0x13a   : > { %v730_v23 = vmul.f32 0.6931472, %v1912_v20 }
 0x13b   : > { %v1914_v24 = vpop.eup %1913 }
 0x13c   : > { %v1916_v25 = vpop.eup %1915  ;;  %v752_v27 = vadd.f32 %v730_v23, %v624_v12  ;;  %v736_v30 = vmul.f32 0.6931472, %v1914_v24 }
 0x13d   : > { %v1918_v31 = vpop.eup %1917  ;;  %v740_v28 = vmul.f32 0.6931472, %v1916_v25 }
 0x13e   : > { %v1609_v9 = vadd.f32 -0.6931472, %v752_v27  ;;  %v755_v35 = vadd.f32 %v736_v30, %v627_v29  ;;  %v738_v42 = vmul.f32 0.6931472, %v1918_v31  ;;  %v1920_v37 = vpop.eup %1919  ;;  %v1034_v30 = vpop.permute.xlu1 %1033 }
 0x13f   : > { %v742_v45 = vmul.f32 0.6931472, %v1920_v37  ;;  %v757_v39 = vadd.f32 %v740_v28, %v629_v43 }
 0x140   : > { %v756_v41 = vadd.f32 %v738_v42, %v628_v34  ;;  %1729 = vmatmul.mubr.msk.f32.gmra.mrb[8].mxu1 %vm786_vm1, %v1609_v9  ;;  %v1612_v16 = vadd.f32 -0.6931472, %v755_v35  ;;  %v1029_v9 = vpop.permute.xlu0 %1028 }
 0x141   : > { %1731 = vmatprep.mubr.msk.f32.mxu1 %vm786_vm1, %v1610_v38  ;;  %v758_v47 = vadd.f32 %v742_v45, %v630_v0  ;;  %v1614_v49 = vadd.f32 -0.6931472, %v757_v39 }
 0x142   : > { %v1613_v46 = vadd.f32 -0.6931472, %v756_v41  ;;  %v1044_v48 = vpop.permute.xlu1 %1043 }
 0x143   : > { %v1615_v40 = vadd.f32 -0.6931472, %v758_v47 }
 0x144   : > { %1732 = vmatmul.mubr.msk.f32.gmra.mrb[10].mxu1 %vm786_vm1, %v1611_v44  ;;  %v1039_v54 = vpop.permute.xlu0 %1038 }
 0x145   : > { %1734 = vmatprep.mubr.msk.f32.mxu1 %vm786_vm1, %v1612_v16 }
 0x148   : > { %1735 = vmatmul.mubr.msk.f32.gmra.mrb[12].mxu1 %vm786_vm1, %v1613_v46 }
 0x149   : > { %1737 = vmatprep.mubr.msk.f32.mxu1 %vm786_vm1, %v1614_v49 }
 0x14c   : > { %1738 = vmatmul.mubr.msk.f32.gmra.mrb[14].mxu1 %vm786_vm1, %v1615_v40 }
 0x14d   : > { %1759 = vmatprep.mubr.msk.f32.mxu1 %vm2010_vm2, %v2011_v58 }
 0x1fd   : > { %v1718_v1 = vpop.f32.mrb[0].mxu1 }
 0x1fe   : > { %v907_v3 = vadd.f32 %v1718_v1, %v2308_v61  ;;  %v901_v53 = vpop.f32.mrb[1].mxu1 }
 0x1ff   : > { %v902_v4 = vadd.f32 %v2308_v61, %v901_v53 }
 0x200   : > { %v1077_v5 = vmul.f32 %v1004_v2, %v907_v3 }
 0x201   : > { %v1076_v7 = vmul.f32 %v999_v56, %v902_v4  ;;  %v1721_v8 = vpop.f32.mrb[2].mxu1 }
 0x202   : > { %v1095_v10 = vmul.f32 %v2314_v62, %v1077_v5  ;;  %v917_v11 = vadd.f32 %v1721_v8, %v2308_v61  ;;  %v911_v59 = vpop.f32.mrb[3].mxu1 }
 0x203   : > { %v1094_v32 = vmul.f32 %v2320_v6, %v1076_v7  ;;  %v912_v14 = vadd.f32 %v2308_v61, %v911_v59 }
 0x204   : > { %v1111_v17 = vsel %vm786_vm1, %v1095_v10, 0.0  ;;  %v1079_v18 = vmul.f32 %v1014_v63, %v917_v11  ;;  %v1054_v10 = vpop.permute.xlu1 %1053 }
 0x205   : > { %v1110_v19 = vsel %vm786_vm1, %v1094_v32, 0.0  ;;  %v1078_v20 = vmul.f32 %v1009_v60, %v912_v14  ;;  %v1724_v21 = vpop.f32.mrb[4].mxu1 }
 0x206   : > { %v1112_v22 = vadd.f32 %v1111_v17, %v1110_v19  ;;  %v1097_v12 = vmul.f32 %v2314_v62, %v1079_v18  ;;  %v927_v23 = vadd.f32 %v1724_v21, %v2308_v61  ;;  %v921_v24 = vpop.f32.mrb[5].mxu1 }
 0x207   : > { %v1096_v36 = vmul.f32 %v2320_v6, %v1078_v20  ;;  %v922_v25 = vadd.f32 %v2308_v61, %v921_v24 }
 0x208   : > { %v1113_v26 = vrot.slane %v1112_v22, 4  ;;  %v1120_v27 = vsel %vm786_vm1, %v1097_v12, 0.0  ;;  %v1081_v29 = vmul.f32 %v1024_v13, %v927_v23  ;;  %v1049_v13 = vpop.permute.xlu0 %1048 }
 0x209   : > { %v1119_v31 = vsel %vm786_vm1, %v1096_v36, 0.0  ;;  %v1080_v34 = vmul.f32 %v1019_v15, %v922_v25  ;;  %v1727_v33 = vpop.f32.mrb[6].mxu1 }
 0x20a   : > { %v1114_v35 = vadd.f32 %v1113_v26, %v1112_v22  ;;  %v1121_v42 = vadd.f32 %v1120_v27, %v1119_v31  ;;  %v1099_v37 = vmul.f32 %v2314_v62, %v1081_v29  ;;  %v937_v38 = vadd.f32 %v1727_v33, %v2308_v61  ;;  %v931_v28 = vpop.f32.mrb[7].mxu1 }
 0x20b   : > { %v1098_v41 = vmul.f32 %v2320_v6, %v1080_v34  ;;  %v932_v43 = vadd.f32 %v2308_v61, %v931_v28 }
 0x20c   : > { %v1115_v16 = vrot.slane %v1114_v35, 2  ;;  %v1122_v44 = vrot.slane %v1121_v42, 4  ;;  %v1129_v45 = vsel %vm786_vm1, %v1099_v37, 0.0  ;;  %v1083_v39 = vmul.f32 %v1034_v30, %v937_v38  ;;  %v1064_v30 = vpop.permute.xlu1 %1063 }
 0x20d   : > { %v1128_v0 = vsel %vm786_vm1, %v1098_v41, 0.0  ;;  %v1082_v46 = vmul.f32 %v1029_v9, %v932_v43 }
 0x20e   : > { %v1116_v47 = vadd.f32 %v1115_v16, %v1114_v35  ;;  %v1123_v49 = vadd.f32 %v1122_v44, %v1121_v42  ;;  %v1130_v40 = vadd.f32 %v1129_v45, %v1128_v0  ;;  %v1101_v50 = vmul.f32 %v2314_v62, %v1083_v39  ;;  %v1059_v35 = vpop.permute.xlu0 %1058 }
 0x20f   : > { %v1100_v52 = vmul.f32 %v2320_v6, %v1082_v46 }
 0x210   : > { %v1124_v55 = vrot.slane %v1123_v49, 2  ;;  %v1131_v57 = vrot.slane %v1130_v40, 4  ;;  %v1138_v58 = vsel %vm786_vm1, %v1101_v50, 0.0  ;;  %v1117_v60 = vrot.slane %v1116_v47, 1 }
 0x211   : > { %v1137_v56 = vsel %vm786_vm1, %v1100_v52, 0.0 }
 0x212   : > { %v1125_v63 = vadd.f32 %v1124_v55, %v1123_v49  ;;  %v1132_v1 = vadd.f32 %v1131_v57, %v1130_v40  ;;  %v1139_v2 = vadd.f32 %v1138_v58, %v1137_v56  ;;  %v1118_v11 = vadd.f32 %v1117_v60, %v1116_v47  ;;  %v1074_v57 = vpop.permute.xlu1 %1073 }
 0x213   : > { %v1730_v3 = vpop.f32.mrb[8].mxu1 }
 0x214   : > { %v1126_v53 = vrot.slane %v1125_v63, 1  ;;  %v1133_v4 = vrot.slane %v1132_v1, 2  ;;  %v1140_v5 = vrot.slane %v1139_v2, 4  ;;  %v947_v7 = vadd.f32 %v1730_v3, %v2308_v61  ;;  %v941_v8 = vpop.f32.mrb[9].mxu1 }
 0x215   : > { %v942_v59 = vadd.f32 %v2308_v61, %v941_v8 }
 0x216   : > { %v1127_v32 = vadd.f32 %v1126_v53, %v1125_v63  ;;  %v1134_v14 = vadd.f32 %v1133_v4, %v1132_v1  ;;  %v1141_v15 = vadd.f32 %v1140_v5, %v1139_v2  ;;  %v1085_v17 = vmul.f32 %v1044_v48, %v947_v7  ;;  %v1069_v63 = vpop.permute.xlu0 %1068 }
 0x217   : > { %v1084_v18 = vmul.f32 %v1039_v54, %v942_v59  ;;  %v1733_v19 = vpop.f32.mrb[10].mxu1 }
 0x218   : > { %v1202_v20 = vsel %vm1201_vm3, %v1127_v32, %v1118_v11  ;;  %v1135_v21 = vrot.slane %v1134_v14, 1  ;;  %v1142_v22 = vrot.slane %v1141_v15, 2  ;;  %v1103_v12 = vmul.f32 %v2314_v62, %v1085_v17  ;;  %v951_v23 = vpop.f32.mrb[11].mxu1 }
 0x219   : > { %v1102_v24 = vmul.f32 %v2320_v6, %v1084_v18  ;;  %v957_v36 = vadd.f32 %v1733_v19, %v2308_v61  ;;  %v952_v25 = vadd.f32 %v2308_v61, %v951_v23 }
 0x21a   : > { %v1136_v26 = vadd.f32 %v1135_v21, %v1134_v14  ;;  %v1143_v27 = vadd.f32 %v1142_v22, %v1141_v15  ;;  %v1147_v29 = vsel %vm786_vm1, %v1103_v12, 0.0 }
 0x21b   : > { %v1146_v31 = vsel %vm786_vm1, %v1102_v24, 0.0  ;;  %v1087_v34 = vmul.f32 %v1054_v10, %v957_v36  ;;  %v1086_v33 = vmul.f32 %v1049_v13, %v952_v25  ;;  %v1736_v9 = vpop.f32.mrb[12].mxu1 }
 0x21c   : > { %v1204_v42 = vsel %vm1203_vm4, %v1136_v26, %v1202_v20  ;;  %v1144_v37 = vrot.slane %v1143_v27, 1  ;;  %v1148_v38 = vadd.f32 %v1147_v29, %v1146_v31  ;;  %v967_v28 = vadd.f32 %v1736_v9, %v2308_v61  ;;  %v961_v41 = vpop.f32.mrb[13].mxu1  ;;  %v1297_v9 = vld [vmem:[%s2463_s10] sm:$0xff] }
 0x21d   : > { %v1105_v43 = vmul.f32 %v2314_v62, %v1087_v34  ;;  %v1104_v16 = vmul.f32 %v2320_v6, %v1086_v33  ;;  %v962_v44 = vadd.f32 %v2308_v61, %v961_v41  ;;  %v1633_v41 = vld [vmem:[%s2462_s9] ss:$0 sm:$0xff] }
 0x21e   : > { %v1145_v45 = vadd.f32 %v1144_v37, %v1143_v27  ;;  %v1149_v39 = vrot.slane %v1148_v38, 4  ;;  %v1089_v0 = vmul.f32 %v1064_v30, %v967_v28  ;;  %v1299_v37 = vld [vmem:[%s2463_s10 + $0x10] sm:$0xff] }
 0x21f   : > { %v1156_v46 = vsel %vm786_vm1, %v1105_v43, 0.0  ;;  %v1155_v47 = vsel %vm786_vm1, %v1104_v16, 0.0  ;;  %v1088_v49 = vmul.f32 %v1059_v35, %v962_v44  ;;  %v1739_v40 = vpop.f32.mrb[14].mxu1  ;;  %v1298_v35 = vld [vmem:[%s2463_s10 + $0x8] sm:$0xff] }
 0x220   : > { %v1150_v50 = vadd.f32 %v1149_v39, %v1148_v38  ;;  %v1157_v48 = vadd.f32 %v1156_v46, %v1155_v47  ;;  %v1107_v52 = vmul.f32 %v2314_v62, %v1089_v0  ;;  %v977_v54 = vadd.f32 %v1739_v40, %v2308_v61  ;;  %v971_v55 = vpop.f32.mrb[15].mxu1  ;;  %v1300_v38 = vld [vmem:[%s2463_s10 + $0x18] sm:$0xff] }
 0x221   : > { %v1106_v58 = vmul.f32 %v2320_v6, %v1088_v49  ;;  %v972_v60 = vadd.f32 %v2308_v61, %v971_v55  ;;  %v1206_v56 = vsel %vm1205_vm5, %v1145_v45, %v1204_v42  ;;  %v1788_v42 = vpack.c.bf16 %v1298_v35, %v1297_v9 }
 0x222   : > { %v1151_v1 = vrot.slane %v1150_v50, 2  ;;  %v1158_v2 = vrot.slane %v1157_v48, 4  ;;  %v1165_v3 = vsel %vm786_vm1, %v1107_v52, 0.0  ;;  %v1091_v53 = vmul.f32 %v1074_v57, %v977_v54  ;;  %v1636_v52 = vld [vmem:[%s2464_s11] ss:$0 sm:$0xff] }
 0x223   : > { %v1164_v4 = vsel %vm786_vm1, %v1106_v58, 0.0  ;;  %v1090_v5 = vmul.f32 %v1069_v63, %v972_v60  ;;  %1789 = vmatpush3.bf16.msra.mxu1 %v1788_v42  ;;  %v1791_v28 = vpack.c.bf16 %v1300_v38, %v1299_v37 }
 0x224   : > { %v1152_v7 = vadd.f32 %v1151_v1, %v1150_v50  ;;  %v1159_v8 = vadd.f32 %v1158_v2, %v1157_v48  ;;  %v1166_v10 = vadd.f32 %v1165_v3, %v1164_v4  ;;  %v1109_v11 = vmul.f32 %v2314_v62, %v1091_v53  ;;  %1790 = vmatprep.subr.bf16.mxu1 %v2009_v51 }
 0x225   : > { %v1108_v59 = vmul.f32 %v2320_v6, %v1090_v5 }
 0x226   : > { %v1153_v13 = vrot.slane %v1152_v7, 1  ;;  %v1160_v32 = vrot.slane %v1159_v8, 2  ;;  %v1167_v61 = vrot.slane %v1166_v10, 4  ;;  %v1174_v14 = vsel %vm786_vm1, %v1109_v11, 0.0 }
 0x227   : > { %v1173_v15 = vsel %vm786_vm1, %v1108_v59, 0.0  ;;  %1792 = vmatpush3.bf16.msra.mxu1 %v1791_v28 }
 0x228   : > { %v1154_v17 = vadd.f32 %v1153_v13, %v1152_v7  ;;  %v1161_v18 = vadd.f32 %v1160_v32, %v1159_v8  ;;  %v1168_v19 = vadd.f32 %v1167_v61, %v1166_v10  ;;  %v1175_v20 = vadd.f32 %v1174_v14, %v1173_v15 }
 0x22a   : > { %v1162_v21 = vrot.slane %v1161_v18, 1  ;;  %v1169_v22 = vrot.slane %v1168_v19, 2  ;;  %v1176_v12 = vrot.slane %v1175_v20, 4  ;;  %v1208_v23 = vsel %vm1207_vm6, %v1154_v17, %v1206_v56 }
 0x22c   : > { %v1163_v62 = vadd.f32 %v1162_v21, %v1161_v18  ;;  %v1170_v24 = vadd.f32 %v1169_v22, %v1168_v19  ;;  %v1177_v6 = vadd.f32 %v1176_v12, %v1175_v20 }
 0x22e   : > { %v1171_v36 = vrot.slane %v1170_v24, 1  ;;  %v1178_v25 = vrot.slane %v1177_v6, 2  ;;  %v1210_v26 = vsel %vm1209_vm7, %v1163_v62, %v1208_v23 }
 0x230   : > { %v1172_v27 = vadd.f32 %v1171_v36, %v1170_v24  ;;  %v1179_v29 = vadd.f32 %v1178_v25, %v1177_v6 }
 0x232   : > { %v1180_v30 = vrot.slane %v1179_v29, 1  ;;  %v1212_v31 = vsel %vm1211_vm8, %v1172_v27, %v1210_v26 }
 0x234   : > { %v1181_v34 = vadd.f32 %v1180_v30, %v1179_v29 }
 0x236   : > { %v1214_v33 = vsel %vm1213_vm9, %v1181_v34, %v1212_v31 }
 0x237   : > { %1749 = vmatmul.mubr.msk.f32.vlgmr.msra.gmra.mrb[16].mxu0 %vm786_vm1, %v1214_v33 }
 0x30a   : > { %v1283_v43 = vpop.f32.mrb[16].mxu0 }
 0x30b   : > { %v1284_v16 = vadd.f32 %v1633_v41, %v1283_v43  ;;  %v1750_v44 = vpop.f32.mrb[17].mxu0 }
 0x30d   : > { %v1288_v45 = vand.u32 2147483647, %v1284_v16  ;;  %v1287_v49 = vmax.f32 %v1284_v16, 0.0 }
 0x30f   : > { %v1289_v39 = vsub.f32 0.0, %v1288_v45 }
 0x311   : > { %v1290_v51 = vmul.f32 1.442695, %v1289_v39 }
 0x313   : > { %1921 = vpow2.f32 %v1290_v51 }
 0x31d   : > { %v1922_v0 = vpop.eup %1921 }
 0x31e   : > { %v1292_v46 = vadd.f32 1.0, %v1922_v0 }
 0x320   : > { %1923 = vlog2.f32 %v1292_v46 }
 0x32a   : > { %v1924_v47 = vpop.eup %1923 }
 0x32b   : > { %v1294_v40 = vmul.f32 0.6931472, %v1924_v47 }
 0x32d   : > { %v1295_v50 = vadd.f32 %v1294_v40, %v1287_v49 }
 0x32f   : > { %v1635_v48 = vadd.f32 -0.6931472, %v1295_v50 }
 0x331   : > { %1760 = vmatmul.mubr.msk.f32.vlgmr.msra.gmra.mrb[16].mxu1 %vm786_vm1, %v1635_v48 }
 0x404   : > { %v1377_v54 = vpop.f32.mrb[16].mxu1 }
 0x405   : > { %v1378_v55 = vadd.f32 %v1636_v52, %v1377_v54  ;;  %v1761_v57 = vpop.f32.mrb[17].mxu1 }
 0x407   : > { %1381 = vst [vmem:[%s2147_s13] sm:$0xff] %v1378_v55 }
 0x408 PF: > { %p1638_p3 = scmp.ne.s32.totalorder %s2137_s22, 0 }
 0x409   : > { %v1402_v58 = vld [vmem:[%s2463_s10] sm:$0xff] (!%p1638_p3)  ;;  %v1403_v60 = vld [vmem:[%s2463_s10 + $0x8] sm:$0xff] (!%p1638_p3)  ;;  %v1404_v56 = vld [vmem:[%s2463_s10 + $0x10] sm:$0xff] (!%p1638_p3)  ;;  %v2012_v63 = vmov (!%p1638_p3), 0.0|0.0   ;;  %vm2013_vm10 = vmmov (!%p1638_p3), 0   ;;  %v2014_v3 = vmov (!%p1638_p3), 0.0   ;;  %v1398_v59 = vlaneseq (!%p1638_p3) }
 0x40a   : > { %1385 = sbr.rel (%p1638_p3) target bundleno = 1288 (0x508), region = 72  ;;  %1793 = vmatprep.subr.bf16.mxu0 (!%p1638_p3), %v2012_v63  ;;  %v1794_v1 = vpack.c.bf16 (!%p1638_p3), %v1403_v60, %v1402_v58  ;;  %v1405_v2 = vld [vmem:[%s2463_s10 + $0x18] sm:$0xff] (!%p1638_p3)  ;;  %1770 = vmatprep.mubr.msk.f32.mxu0 (!%p1638_p3), %vm2013_vm10, %v2014_v3  ;;  %v1386_v53 = vld [vmem:[%s2462_s9] sm:$0x1] (!%p1638_p3)  ;;  %vm1413_vm11 = vcmask (!%p1638_p3), 261120  }
 0x40b   : > { %v1388_v4 = vand.u32 (!%p1638_p3), 2147483647, %v1386_v53  ;;  %v1797_v5 = vpack.c.bf16 (!%p1638_p3), %v1405_v2, %v1404_v56  ;;  %v1387_v13 = vmax.f32 (!%p1638_p3), %v1386_v53, 0.0  ;;  %v1399_v32 = vshrl.u32 (!%p1638_p3), %v1398_v59, 7  ;;  %v1640_v20 = vld [vmem:[%s2464_s11] ss:$0 sm:$0xff] (!%p1638_p3) }
 0x40c   : > { %1795 = vmatpush3.bf16.msra.mxu0 (!%p1638_p3), %v1794_v1 }
 0x40d   : > { %1796 = vmatprep.subr.bf16.mxu0 (!%p1638_p3), %v2012_v63  ;;  %v1389_v7 = vsub.f32 (!%p1638_p3), 0.0, %v1388_v4  ;;  %v1400_v17 = vsub.s32 (!%p1638_p3), 0, %v1399_v32 }
 0x40f   : > { %v1390_v8 = vmul.f32 (!%p1638_p3), 1.442695, %v1389_v7 }
 0x410   : > { %1798 = vmatpush3.bf16.msra.mxu0 (!%p1638_p3), %v1797_v5 }
 0x411   : > { %1925 = vpow2.f32 %v1390_v8 }
 0x41b   : > { %v1926_v10 = vpop.eup %1925 }
 0x41c   : > { %v1392_v11 = vadd.f32 1.0, %v1926_v10 }
 0x41e   : > { %1927 = vlog2.f32 %v1392_v11 }
 0x428   : > { %v1928_v61 = vpop.eup %1927 }
 0x429   : > { %v1394_v14 = vmul.f32 0.6931472, %v1928_v61 }
 0x42b   : > { %v1395_v15 = vadd.f32 %v1394_v14, %v1387_v13 }
 0x42d   : > { %v1639_v18 = vadd.f32 -0.6931472, %v1395_v15 }
 0x42f   : > { %v1401_v19 = vrot.slane %v1639_v18, %v1400_v17 }
 0x431   : > { %1771 = vmatmul.mubr.msk.f32.vlgmr.msra.gmra.mrb[0].mxu0 %vm1413_vm11, %v1401_v19 }
 0x504   : > { %v1482_v21 = vpop.f32.mrb[0].mxu0 }
 0x505   : > { %v1483_v22 = vadd.f32 %v1640_v20, %v1482_v21  ;;  %v1772_v12 = vpop.f32.mrb[1].mxu0 }
 0x507   : > { %1486 = vst [vmem:[%s2147_s13] sm:$0xff] %v1483_v22 }
 0x508 PF: > { %s1643_s15 = sshll.u32 %s2105_s29, 7  ;;  %s1501_s20 = sshll.u32 %s2147_s13, 4  ;;  %s1502_s20 = int_to_ptr.vmem [resolvable:$true] %s1501_s20 }
 0x509   : > { %s2414_s19 = scalar_lea.hbm %s2465_s12, %s1643_s15  ;;  %s2477_s21 = sand.u32 1, %s1997_s27  }
 0x50a   : > { %s1488_s23 = scalar_lea.sflag [#allocation5], %s2477_s21  ;;  %s1941_s24 = scalar_lea.vmem %s1502_s20, 128 }
 0x50b   : > { %p1942_p4 = scmp.ne.s32.totalorder %s1502_s20, %s1941_s24  ;;  %s2015_s25 = smov [#allocation4]  }
 0x50c   : > { %s1945_s22 = sshll.u32 %s2015_s25, 4  ;;  %s1946_s22 = int_to_ptr.vmem [resolvable:$false] %s1945_s22 }
 0x50d   : > { %p1943_p5 = pnand %p1942_p4, %p2122_p10  ;;  %s1947_s30 = scalar_lea.vmem %s1946_s22, 256 }
 0x50e   : > { %p1948_p7 = scmp.lt.s32.totalorder %s1502_s20, %s1946_s22  ;;  %p1949_p8 = scmp.lt.s32.totalorder %s1947_s30, %s1941_s24 }
 0x50f   : > { %p1944_p6 = pneg %p1943_p5 }
 0x510   : > { %p1950_p9 = por %p1949_p8, %p1948_p7 }
 0x512   : > { %p1951_p12 = pnand %p1950_p9, %p1944_p6 }
 0x514   : > { %1954 = shalt.err (!%p1951_p12)
}
 0x515   : > { %s1955_s29 = scalar_lea.hbm %s2414_s19, 128  ;;  %s1959_s0 = scalar_lea.hbm %s2465_s12, 256 }
 0x516   : > { %p1956_p13 = scmp.ne.s32.totalorder %s2414_s19, %s1955_s29  ;;  %p1960_p2 = scmp.lt.u32.totalorder %s2414_s19, %s2465_s12 }
 0x517   : > { %p1961_p3 = scmp.lt.u32.totalorder %s1959_s0, %s1955_s29  ;;  %p1963_p5 = scmp.lt.u32.totalorder %s1955_s29, %s2414_s19 }
 0x518   : > { %p1957_p0 = pnand %p1956_p13, %p2122_p10 }
 0x519   : > { %p1962_p4 = por %p1961_p3, %p1960_p2 }
 0x51a   : > { %p1958_p1 = pneg %p1957_p0 }
 0x51b   : > { %p1964_p6 = por %p1963_p5, %p1962_p4 }
 0x51d   : > { %p1965_p7 = pnand %p1964_p6, %p1958_p1 }
 0x51f   : > { %1968 = shalt.err (!%p1965_p7)
}
 0x520   : > { %1799 = dma.vmem_to_hbm [thread:$0]  (%p2122_p10), %s1502_s20, 128, %s2414_s19, %s1488_s23  }
 0x521 PF: > { %p1805_p8 = scmp.ge.s32.totalorder %s2005_s28, 2  ;;  %s1513_s21 = sand.u32 1, %s1993_s26  }
 0x522   : > { %s1514_s24 = scalar_lea.sflag [#allocation5], %s1513_s21 }
 0x523   : > { %p1802_p9 = pnand %p1805_p8, %p2126_p11 }
 0x525   : > { %1988 = dma.done.wait (!%p1802_p9), %s1514_s24, 128  }
 0x526   : > { %1990 = vsyncadd (!%p1802_p9), %s1514_s24, 4294967168  ;;  %s2479_s28 = sld [smem:[#allocation9_spill]]  ;;  %s2480_s25 = sld [smem:[#allocation8_spill]] }
 0x527   : > { %s2481_s0 = sld [smem:[#allocation10_spill]]  ;;  %s2482_s26 = smov %s1997_s27 }
 0x52c   : > { %p28_p12 = scmp.ge.s32.totalorder %s2479_s28, 4   ;;  %s2483_s27 = smov %s2480_s25 }
 0x52e   :  { %30 = sbr.rel (!%p28_p12) target bundleno = 18 (0x12), region = 110 }
 0x535   :  { %1519 = vsyncpa [#allocation5], 1 }
 0x536   :  { %1521 = vsyncpa [#allocation5 + $0x1], 1 }

</bundles_post_ra>
